<compile_context>
chip_gen: v6e
topology: v6e:2x2x1
jax: 0.10.0
libtpu: 0.0.40
codegen_flags: <defaults>
</compile_context>

<pallas_src>
import functools

import jax
import jax.numpy as jnp
from jax.experimental import pallas as pl
from jax.experimental.pallas import tpu as pltpu


def _chip_info():
    """Best-effort (VMEM bytes, is_v7x). Safe fallbacks if queries fail."""
    kind = ""
    try:
        kind = jax.devices()[0].device_kind.lower()
    except Exception:
        pass
    is_v7x = "v7" in kind
    vmem = None
    try:
        vmem = int(getattr(pltpu.get_tpu_info(), "vmem_capacity_bytes"))
    except Exception:
        vmem = None
    if vmem is None:
        vmem = (64 << 20) if is_v7x else (128 << 20)
    if is_v7x:
        vmem = min(vmem, 64 << 20)          # per-TC VMEM on v7x
    return vmem, is_v7x


def _diffloss_kernel(d1_ref, d2_ref, gram_ref, s1_ref, s2_ref, *,
                     feat, steps, total_tiles, has_tail, need_clamp):
    """Accumulate D1 @ D2.T and per-row sum-of-squares over feature tiles.

    Grid is (num_splits, steps).  Axis 0 splits the feature reduction across
    cores; axis 1 is the sequential reduction over feature tiles.  Output
    blocks are indexed only by the split index, so they stay resident in VMEM
    across axis 1 and act as accumulators (init at k == 0).
    """
    c = pl.program_id(0)
    k = pl.program_id(1)

    @pl.when(k == 0)
    def _():
        gram_ref[...] = jnp.zeros_like(gram_ref)
        s1_ref[...] = jnp.zeros_like(s1_ref)
        s2_ref[...] = jnp.zeros_like(s2_ref)

    tile = c * steps + k                     # global feature-tile index
    tk = d1_ref.shape[1]

    def accumulate(d1, d2):
        # Gram block on the MXU in the NATIVE input dtype, f32 accumulation.
        gram_ref[...] += jax.lax.dot_general(
            d1, d2,
            dimension_numbers=(((1,), (1,)), ((), ())),
            preferred_element_type=jnp.float32,
        )
        # Per-row sum of squares: upcast only here (VPU mul + XLU reduce).
        d1f = d1.astype(jnp.float32)
        d2f = d2.astype(jnp.float32)
        s1_ref[...] += jnp.sum(d1f * d1f, axis=1, keepdims=True)
        s2_ref[...] += jnp.sum(d2f * d2f, axis=1, keepdims=True)

    in_range = (tile < total_tiles) if need_clamp else None

    if has_tail:
        is_tail = tile == (total_tiles - 1)
        full_pred = jnp.logical_not(is_tail)
        tail_pred = is_tail
        if in_range is not None:
            full_pred = jnp.logical_and(in_range, full_pred)
            tail_pred = jnp.logical_and(in_range, tail_pred)

        @pl.when(full_pred)
        def _():
            # Interior tiles: no masking work at all.
            accumulate(d1_ref[...], d2_ref[...])

        @pl.when(tail_pred)
        def _():
            # Only the single genuinely-partial tile pays the iota + selects.
            # NOTE: mask (select) MUST happen before the dot — the padded part
            # of a partial VMEM block is undefined.
            col = jax.lax.broadcasted_iota(jnp.int32, (1, tk), 1)
            valid = (tile * tk + col) < feat
            d1 = d1_ref[...]
            d2 = d2_ref[...]
            zero = jnp.array(0, dtype=d1.dtype)
            accumulate(jnp.where(valid, d1, zero), jnp.where(valid, d2, zero))
    else:
        if in_range is not None:
            @pl.when(in_range)
            def _():
                accumulate(d1_ref[...], d2_ref[...])
        else:
            accumulate(d1_ref[...], d2_ref[...])


@functools.partial(jax.jit, static_argnames=("tk", "num_splits"))
def diff_loss(D1, D2, tk=None, num_splits=None):
    B = D1.shape[0]
    d1 = D1.reshape(B, -1)               # stream in native dtype (kernel upcasts only where needed)
    d2 = D2.reshape(B, -1)
    assert d1.shape == d2.shape, "D1 and D2 must flatten to the same (B, F)"
    F = d1.shape[1]

    vmem_bytes, is_v7x = _chip_info()
    elt = jnp.dtype(d1.dtype).itemsize
    B_pad = ((B + 7) // 8) * 8           # sublane padding of a (B, tk) block
    B_lane = ((B + 127) // 128) * 128    # lane padding of the (B, B) Gram block

    # Core split of the feature reduction: only worth it on v7x (2 TCs).
    if num_splits is None:
        num_splits = 2 if is_v7x else 1

    # --- Generation-aware VMEM budgeting -----------------------------------
    # Resident / double-buffered outputs: Gram + two (B,1) sum-of-squares.
    out_resident = 2 * 4 * (B_pad * B_lane + 2 * B_pad * 128)
    vmem_limit = int(min((48 << 20) if is_v7x else (96 << 20),
                         (vmem_bytes * 3) // 4))
    base_in = (24 << 20) if is_v7x else (40 << 20)
    in_budget = max(min(base_in, vmem_limit - out_resident - (4 << 20)), 2 << 20)

    # Largest lane tile keeping 2 inputs x 2 pipeline buffers in budget; no
    # hard lane cap — a single-step grid (tk = rounded F) falls out naturally.
    if tk is None:
        tk = in_budget // (2 * 2 * B_pad * elt)
    F_round = ((F + 127) // 128) * 128
    tk = min(int(tk), F_round)
    tk = max((tk // 128) * 128, 128)     # multiple of 128

    T = -(-F // tk)                      # number of feature tiles
    num_splits = max(1, min(int(num_splits), T))
    steps = -(-T // num_splits)          # tiles per split (rectangular grid)

    need_clamp = steps * num_splits != T  # some split has a duplicate tile
    has_tail = (F % tk) != 0              # one genuinely partial tile

    if need_clamp:
        def in_map(c, k):
            # Keep every DMA in-bounds: duplicate tiles are clamped to the last
            # valid tile and skipped (zero compute) inside the kernel.
            return (0, jnp.minimum(c * steps + k, T - 1))
    else:
        def in_map(c, k):
            return (0, c * steps + k)

    if num_splits > 1 and is_v7x:
        semantics = (pltpu.CORE_PARALLEL, pltpu.ARBITRARY)
    elif num_splits > 1:
        semantics = ("parallel", "arbitrary")
    else:
        semantics = ("arbitrary", "arbitrary")

    out_shapes = (
        jax.ShapeDtypeStruct((num_splits, B, B), jnp.float32),   # partial Gram
        jax.ShapeDtypeStruct((num_splits, B, 1), jnp.float32),   # partial |d1|^2
        jax.ShapeDtypeStruct((num_splits, B, 1), jnp.float32),   # partial |d2|^2
    )

    gram_p, s1_p, s2_p = pl.pallas_call(
        functools.partial(_diffloss_kernel, feat=F, steps=steps,
                          total_tiles=T, has_tail=has_tail,
                          need_clamp=need_clamp),
        out_shape=out_shapes,
        grid_spec=pltpu.PrefetchScalarGridSpec(
            num_scalar_prefetch=0,
            grid=(num_splits, steps),
            in_specs=[
                pl.BlockSpec((B, tk), in_map),
                pl.BlockSpec((B, tk), in_map),
            ],
            out_specs=[
                pl.BlockSpec((None, B, B), lambda c, k: (c, 0, 0)),
                pl.BlockSpec((None, B, 1), lambda c, k: (c, 0, 0)),
                pl.BlockSpec((None, B, 1), lambda c, k: (c, 0, 0)),
            ],
        ),
        compiler_params=pltpu.CompilerParams(
            dimension_semantics=semantics,
            vmem_limit_bytes=vmem_limit,
        ),
    )(d1, d2)

    # Tiny epilogue: combine per-split partials, normalize, square, mean.
    gram = jnp.sum(gram_p, axis=0)                      # (B, B) = D1 @ D2.T
    s1 = jnp.sum(s1_p, axis=0)                          # (B, 1)
    s2 = jnp.sum(s2_p, axis=0)                          # (B, 1)
    eps = jnp.float32(1e-6)
    n1 = jnp.sqrt(s1) + eps
    n2 = jnp.sqrt(s2) + eps
    g = gram / (n1 * n2.T)                              # N1 @ N2.T
    return jnp.mean(g * g)


def _diff_loss_ref(D1, D2):
    B = D1.shape[0]
    d1 = D1.reshape(B, -1).astype(jnp.float32)
    d2 = D2.reshape(B, -1).astype(jnp.float32)
    n1 = d1 / (jnp.linalg.norm(d1, axis=1, keepdims=True) + 1e-6)
    n2 = d2 / (jnp.linalg.norm(d2, axis=1, keepdims=True) + 1e-6)
    return jnp.mean((n1 @ n2.T) ** 2)


if __name__ == "__main__":
    key = jax.random.PRNGKey(0)
    k1, k2, k3, k4, k5, k6 = jax.random.split(key, 6)

    # NCHW inputs, consistent with the PyTorch .view(B, -1).
    # F = 1024 -> single-step fast path (tk = F, grid (1,1), no masking).
    D1 = jax.random.normal(k1, (2, 4, 16, 16), dtype=jnp.float32)
    D2 = jax.random.normal(k2, (2, 4, 16, 16), dtype=jnp.float32)
    loss = diff_loss(D1, D2)
    jax.block_until_ready(loss)
    ref = _diff_loss_ref(D1, D2)
    assert jnp.allclose(loss, ref, rtol=1e-4, atol=1e-6), (loss, ref)

    # Exercise the tail-masking + clamped-duplicate multi-split path:
    # F = 3*10*10 = 300 is not a multiple of 128 and T=3 tiles split unevenly.
    E1 = jax.random.normal(k3, (4, 3, 10, 10), dtype=jnp.float32)
    E2 = jax.random.normal(k4, (4, 3, 10, 10), dtype=jnp.float32)
    loss2 = diff_loss(E1, E2, tk=128, num_splits=2)
    jax.block_until_ready(loss2)
    ref2 = _diff_loss_ref(E1, E2)
    assert jnp.allclose(loss2, ref2, rtol=1e-4, atol=1e-6), (loss2, ref2)

    # Exercise the native-dtype (bf16) MXU path.
    G1 = jax.random.normal(k5, (4, 8, 8, 8), dtype=jnp.bfloat16)
    G2 = jax.random.normal(k6, (4, 8, 8, 8), dtype=jnp.bfloat16)
    loss3 = diff_loss(G1, G2)
    jax.block_until_ready(loss3)
    ref3 = _diff_loss_ref(G1, G2)
    assert jnp.allclose(loss3, ref3, rtol=5e-3, atol=1e-5), (loss3, ref3)

    print("KERNEL_OK")
</pallas_src>

<mosaic_0001>
module attributes {stable_mosaic.version = 11 : i64} {
  func.func @_diffloss_kernel(%arg0: i32, %arg1: i32, %arg2: memref<2x1024xf32, #tpu.memory_space<vmem>>, %arg3: memref<2x1024xf32, #tpu.memory_space<vmem>>, %arg4: memref<1x2x2xf32, #tpu.memory_space<vmem>>, %arg5: memref<1x2x1xf32, #tpu.memory_space<vmem>>, %arg6: memref<1x2x1xf32, #tpu.memory_space<vmem>>) attributes {dimension_semantics = [#tpu.dimension_semantics<arbitrary>, #tpu.dimension_semantics<arbitrary>], iteration_bounds = array<i64: 1, 1>, scalar_prefetch = 0 : i64, scratch_operands = 0 : i64, tpu.core_type = #tpu.core_type<tc>, window_params = [{transform_indices = @transform_0, window_bounds = array<i64: 2, 1024>}, {transform_indices = @transform_1, window_bounds = array<i64: 2, 1024>}, {transform_indices = @transform_2, window_bounds = array<i64: 1, 2, 2>}, {transform_indices = @transform_3, window_bounds = array<i64: 1, 2, 1>}, {transform_indices = @transform_4, window_bounds = array<i64: 1, 2, 1>}]} {
    %c0_i32 = arith.constant 0 : i32
    %0 = arith.cmpi eq, %arg1, %c0_i32 : i32
    %1 = arith.extui %0 : i1 to i32
    %c0_i32_0 = arith.constant 0 : i32
    %2 = arith.cmpi ne, %1, %c0_i32_0 : i32
    scf.if %2 {
      %cst_24 = arith.constant 0.000000e+00 : f32
      %30 = vector.broadcast %cst_24 : f32 to vector<2x2xf32>
      %c0_25 = arith.constant 0 : index
      %c0_26 = arith.constant 0 : index
      %c0_27 = arith.constant 0 : index
      %31 = vector.load %arg4[%c0_25, %c0_26, %c0_27] : memref<1x2x2xf32, #tpu.memory_space<vmem>>, vector<1x2x2xf32>
      %32 = vector.shape_cast %31 : vector<1x2x2xf32> to vector<2x2xf32>
      %33 = vector.shape_cast %30 : vector<2x2xf32> to vector<1x2x2xf32>
      tpu.vector_store %arg4[%c0_25, %c0_26, %c0_27], %33 {strides = array<i32>} : memref<1x2x2xf32, #tpu.memory_space<vmem>>, vector<1x2x2xf32>,
      %cst_28 = arith.constant 0.000000e+00 : f32
      %34 = vector.broadcast %cst_28 : f32 to vector<2x1xf32>
      %c0_29 = arith.constant 0 : index
      %c0_30 = arith.constant 0 : index
      %c0_31 = arith.constant 0 : index
      %35 = vector.load %arg5[%c0_29, %c0_30, %c0_31] : memref<1x2x1xf32, #tpu.memory_space<vmem>>, vector<1x2x1xf32>
      %36 = vector.shape_cast %35 : vector<1x2x1xf32> to vector<2x1xf32>
      %37 = vector.shape_cast %34 : vector<2x1xf32> to vector<1x2x1xf32>
      tpu.vector_store %arg5[%c0_29, %c0_30, %c0_31], %37 {strides = array<i32>} : memref<1x2x1xf32, #tpu.memory_space<vmem>>, vector<1x2x1xf32>,
      %cst_32 = arith.constant 0.000000e+00 : f32
      %38 = vector.broadcast %cst_32 : f32 to vector<2x1xf32>
      %c0_33 = arith.constant 0 : index
      %c0_34 = arith.constant 0 : index
      %c0_35 = arith.constant 0 : index
      %39 = vector.load %arg6[%c0_33, %c0_34, %c0_35] : memref<1x2x1xf32, #tpu.memory_space<vmem>>, vector<1x2x1xf32>
      %40 = vector.shape_cast %39 : vector<1x2x1xf32> to vector<2x1xf32>
      %41 = vector.shape_cast %38 : vector<2x1xf32> to vector<1x2x1xf32>
      tpu.vector_store %arg6[%c0_33, %c0_34, %c0_35], %41 {strides = array<i32>} : memref<1x2x1xf32, #tpu.memory_space<vmem>>, vector<1x2x1xf32>,
    } else {
    }
    %c0 = arith.constant 0 : index
    %c0_1 = arith.constant 0 : index
    %3 = vector.load %arg2[%c0, %c0_1] : memref<2x1024xf32, #tpu.memory_space<vmem>>, vector<2x1024xf32>
    %c0_2 = arith.constant 0 : index
    %c0_3 = arith.constant 0 : index
    %4 = vector.load %arg3[%c0_2, %c0_3] : memref<2x1024xf32, #tpu.memory_space<vmem>>, vector<2x1024xf32>
    %c0_4 = arith.constant 0 : index
    %c0_5 = arith.constant 0 : index
    %c0_6 = arith.constant 0 : index
    %5 = vector.load %arg4[%c0_4, %c0_5, %c0_6] : memref<1x2x2xf32, #tpu.memory_space<vmem>>, vector<1x2x2xf32>
    %6 = vector.shape_cast %5 : vector<1x2x2xf32> to vector<2x2xf32>
    %cst = arith.constant dense<0.000000e+00> : vector<2x2xf32>
    %7 = tpu.matmul %3, %4, %cst {dimension_numbers = #tpu.dot_dimension_numbers<[1], [1], [0], [0], [0, 0, 1, 0], [], []>} : vector<2x1024xf32>, vector<2x1024xf32>, vector<2x2xf32> -> vector<2x2xf32>
    %8 = arith.addf %6, %7 : vector<2x2xf32>
    %c0_7 = arith.constant 0 : index
    %c0_8 = arith.constant 0 : index
    %c0_9 = arith.constant 0 : index
    %9 = vector.load %arg4[%c0_7, %c0_8, %c0_9] : memref<1x2x2xf32, #tpu.memory_space<vmem>>, vector<1x2x2xf32>
    %10 = vector.shape_cast %9 : vector<1x2x2xf32> to vector<2x2xf32>
    %11 = vector.shape_cast %8 : vector<2x2xf32> to vector<1x2x2xf32>
    tpu.vector_store %arg4[%c0_7, %c0_8, %c0_9], %11 {strides = array<i32>} : memref<1x2x2xf32, #tpu.memory_space<vmem>>, vector<1x2x2xf32>,
    %c0_10 = arith.constant 0 : index
    %c0_11 = arith.constant 0 : index
    %c0_12 = arith.constant 0 : index
    %12 = vector.load %arg5[%c0_10, %c0_11, %c0_12] : memref<1x2x1xf32, #tpu.memory_space<vmem>>, vector<1x2x1xf32>
    %13 = vector.shape_cast %12 : vector<1x2x1xf32> to vector<2x1xf32>
    %14 = arith.mulf %3, %3 : vector<2x1024xf32>
    %cst_13 = arith.constant dense<0.000000e+00> : vector<2xf32>
    %15 = vector.multi_reduction <add>, %14, %cst_13 [1] : vector<2x1024xf32> to vector<2xf32>
    %16 = vector.shape_cast %15 : vector<2xf32> to vector<2x1xf32>
    %17 = arith.addf %13, %16 : vector<2x1xf32>
    %c0_14 = arith.constant 0 : index
    %c0_15 = arith.constant 0 : index
    %c0_16 = arith.constant 0 : index
    %18 = vector.load %arg5[%c0_14, %c0_15, %c0_16] : memref<1x2x1xf32, #tpu.memory_space<vmem>>, vector<1x2x1xf32>
    %19 = vector.shape_cast %18 : vector<1x2x1xf32> to vector<2x1xf32>
    %20 = vector.shape_cast %17 : vector<2x1xf32> to vector<1x2x1xf32>
    tpu.vector_store %arg5[%c0_14, %c0_15, %c0_16], %20 {strides = array<i32>} : memref<1x2x1xf32, #tpu.memory_space<vmem>>, vector<1x2x1xf32>,
    %c0_17 = arith.constant 0 : index
    %c0_18 = arith.constant 0 : index
    %c0_19 = arith.constant 0 : index
    %21 = vector.load %arg6[%c0_17, %c0_18, %c0_19] : memref<1x2x1xf32, #tpu.memory_space<vmem>>, vector<1x2x1xf32>
    %22 = vector.shape_cast %21 : vector<1x2x1xf32> to vector<2x1xf32>
    %23 = arith.mulf %4, %4 : vector<2x1024xf32>
    %cst_20 = arith.constant dense<0.000000e+00> : vector<2xf32>
    %24 = vector.multi_reduction <add>, %23, %cst_20 [1] : vector<2x1024xf32> to vector<2xf32>
    %25 = vector.shape_cast %24 : vector<2xf32> to vector<2x1xf32>
    %26 = arith.addf %22, %25 : vector<2x1xf32>
    %c0_21 = arith.constant 0 : index
    %c0_22 = arith.constant 0 : index
    %c0_23 = arith.constant 0 : index
    %27 = vector.load %arg6[%c0_21, %c0_22, %c0_23] : memref<1x2x1xf32, #tpu.memory_space<vmem>>, vector<1x2x1xf32>
    %28 = vector.shape_cast %27 : vector<1x2x1xf32> to vector<2x1xf32>
    %29 = vector.shape_cast %26 : vector<2x1xf32> to vector<1x2x1xf32>
    tpu.vector_store %arg6[%c0_21, %c0_22, %c0_23], %29 {strides = array<i32>} : memref<1x2x1xf32, #tpu.memory_space<vmem>>, vector<1x2x1xf32>,
    return
  }
  func.func @transform_0(%arg0: i32, %arg1: i32) -> (i32, i32) {
    %c1_i32 = arith.constant 1 : i32
    %0 = arith.muli %arg0, %c1_i32 : i32
    %1 = arith.addi %0, %arg1 : i32
    %c0_i32 = arith.constant 0 : i32
    %c0_i32_0 = arith.constant 0 : i32
    return %c0_i32, %1 : i32, i32
  }
  func.func @transform_1(%arg0: i32, %arg1: i32) -> (i32, i32) {
    %c1_i32 = arith.constant 1 : i32
    %0 = arith.muli %arg0, %c1_i32 : i32
    %1 = arith.addi %0, %arg1 : i32
    %c0_i32 = arith.constant 0 : i32
    %c0_i32_0 = arith.constant 0 : i32
    return %c0_i32, %1 : i32, i32
  }
  func.func @transform_2(%arg0: i32, %arg1: i32) -> (i32, i32, i32) {
    %c0_i32 = arith.constant 0 : i32
    %c0_i32_0 = arith.constant 0 : i32
    %c0_i32_1 = arith.constant 0 : i32
    return %arg0, %c0_i32, %c0_i32_0 : i32, i32, i32
  }
  func.func @transform_3(%arg0: i32, %arg1: i32) -> (i32, i32, i32) {
    %c0_i32 = arith.constant 0 : i32
    %c0_i32_0 = arith.constant 0 : i32
    %c0_i32_1 = arith.constant 0 : i32
    return %arg0, %c0_i32, %c0_i32_0 : i32, i32, i32
  }
  func.func @transform_4(%arg0: i32, %arg1: i32) -> (i32, i32, i32) {
    %c0_i32 = arith.constant 0 : i32
    %c0_i32_0 = arith.constant 0 : i32
    %c0_i32_1 = arith.constant 0 : i32
    return %arg0, %c0_i32, %c0_i32_0 : i32, i32, i32
  }
}

</mosaic_0001>

<bundles_post_ra>
// kernel: diff_loss.1
= control target key start
LH: loop header
LB: loop body
LE: loop exit
PB: predicated region body
PF: predicated region fallthrough
CT: control target
= control target key end

     0   :  { %v78_v0 = vlaneseq  ;;  %v607_v2 = vmov 1983009808   ;;  %vm490_vm0 = vcmask 1041408   ;;  %vm64_vm1 = vcmask 1024   ;;  %s696_s1 = inlined_call_operand.vmem [shape: f32[2,1024], index: 1, kind: input, shape index: {}]   ;;  %s697_s0 = inlined_call_operand.vmem [shape: f32[2,1024], index: 0, kind: input, shape index: {}]   ;;  %s698_s3 = inlined_call_operand.vmem [shape: f32[1,2,1], index: 3, kind: output, shape index: {1}]   ;;  %s699_s2 = inlined_call_operand.vmem [shape: f32[1,2,2], index: 2, kind: output, shape index: {0}]   ;;  %s700_s4 = inlined_call_operand.vmem [shape: f32[1,2,1], index: 4, kind: output, shape index: {2}]  }
   0x1   :  { %v69_v1 = vld [vmem:[%s696_s1] sm:$0xff]  ;;  %v76_v3 = vunpack.c.l.s4 %v607_v2  ;;  %v70_v7 = vld [vmem:[%s696_s1 + $0x8] sm:$0xff]  ;;  %vm62_vm2 = vcmask 9216  }
   0x2   :  { %v67_v4 = vld [vmem:[%s697_s0] sm:$0xff]  ;;  %v79_v5 = vshrl.u32 %v78_v0, 7  ;;  %v512_v6 = vmul.f32 %v69_v1, %v69_v1  ;;  %v118_v9 = vcombine.high %v69_v1, %v69_v1  ;;  %v68_v10 = vld [vmem:[%s697_s0 + $0x8] sm:$0xff]  ;;  %v646_v12 = vmul.f32 %v70_v7, %v70_v7 }
   0x3   :  { %v77_v8 = vunpack.c.0.s8 %v76_v3  ;;  %v444_v11 = vmul.f32 %v67_v4, %v67_v4  ;;  %v445_v14 = vmul.f32 %v68_v10, %v68_v10  ;;  %v74_v15 = vcombine.high %v67_v4, %v67_v4 }
   0x4   :  { %v516_v13 = vcombine.high %v512_v6, %v512_v6  ;;  %v135_v18 = vcombine.high %v70_v7, %v70_v7  ;;  %v91_v19 = vcombine.high %v68_v10, %v68_v10  ;;  %v533_v21 = vcombine.high %v646_v12, %v646_v12 }
   0x5   :  { %v80_v16 = vsub.s32 %v77_v8, %v79_v5  ;;  %v448_v17 = vcombine.high %v444_v11, %v444_v11  ;;  %v465_v20 = vcombine.high %v445_v14, %v445_v14 }
   0x7   :  { %v125_v22 = vrot.slane %v69_v1, %v80_v16  ;;  %v523_v23 = vrot.slane %v512_v6, %v80_v16  ;;  %v530_v24 = vrot.slane %v516_v13, %v80_v16  ;;  %v132_v25 = vrot.slane %v118_v9, %v80_v16 }
   0x8   :  { %v81_v26 = vrot.slane %v67_v4, %v80_v16  ;;  %v455_v27 = vrot.slane %v444_v11, %v80_v16  ;;  %v462_v28 = vrot.slane %v448_v17, %v80_v16  ;;  %v88_v29 = vrot.slane %v74_v15, %v80_v16 }
   0x9   :  { %v133_v30 = vcombine.high %v125_v22, %v125_v22  ;;  %v531_v31 = vcombine.high %v523_v23, %v523_v23  ;;  %v558_v32 = vsel %vm490_vm0, %v523_v23, 0.0  ;;  %v134_v33 = vcombine.high %v132_v25, %v132_v25 }
   0xa   :  { %v89_v34 = vcombine.high %v81_v26, %v81_v26  ;;  %v463_v35 = vcombine.high %v455_v27, %v455_v27  ;;  %v491_v36 = vsel %vm490_vm0, %v455_v27, 0.0  ;;  %v90_v37 = vcombine.high %v88_v29, %v88_v29 }
   0xb   :  { %190 = vmatprep.subr.mxu0 %v133_v30  ;;  %v559_v38 = vsel %vm490_vm0, %v531_v31, 0.0  ;;  %260 = vmatprep.subr.mxu1 %v134_v33  ;;  %v142_v39 = vrot.slane %v70_v7, %v80_v16  ;;  %v149_v40 = vrot.slane %v135_v18, %v80_v16  ;;  %v98_v41 = vrot.slane %v68_v10, %v80_v16 }
   0xc   :  { %v560_v42 = vadd.f32 %v559_v38, %v558_v32  ;;  %191 = vmatpush1.xpose.msra.mxu0 %v125_v22  ;;  %261 = vmatpush1.xpose.msra.mxu1 %v132_v25  ;;  %v492_v43 = vsel %vm490_vm0, %v463_v35, 0.0  ;;  %v105_v44 = vrot.slane %v91_v19, %v80_v16  ;;  %v464_v45 = vcombine.high %v462_v28, %v462_v28 }
   0xd   :  { %224 = vmatprep.mubr.f32.mxu0 %v89_v34  ;;  %v493_v46 = vadd.f32 %v492_v43, %v491_v36  ;;  %294 = vmatprep.mubr.f32.mxu1 %v90_v37  ;;  %v150_v47 = vcombine.high %v142_v39, %v142_v39  ;;  %v151_v48 = vcombine.high %v149_v40, %v149_v40  ;;  %v494_v49 = vsel %vm490_vm0, %v462_v28, 0.0 }
   0xe   :  { %v106_v50 = vcombine.high %v98_v41, %v98_v41  ;;  %v107_v51 = vcombine.high %v105_v44, %v105_v44  ;;  %v472_v52 = vrot.slane %v445_v14, %v80_v16  ;;  %v479_v53 = vrot.slane %v465_v20, %v80_v16 }
   0xf   :  { %225 = vmatmul.mubr.f32.vlgmr.msra.gmra.mxu0 %v81_v26  ;;  %330 = vmatprep.subr.mxu0 %v150_v47  ;;  %v495_v54 = vadd.f32 %v494_v49, %v493_v46  ;;  %v496_v55 = vsel %vm490_vm0, %v464_v45, 0.0  ;;  %v532_v56 = vcombine.high %v530_v24, %v530_v24  ;;  %v540_v57 = vrot.slane %v646_v12, %v80_v16 }
  0x10   :  { %295 = vmatmul.mubr.f32.vlgmr.msra.gmra.mxu1 %v88_v29  ;;  %331 = vmatpush1.xpose.msra.mxu0 %v142_v39  ;;  %v480_v58 = vcombine.high %v472_v52, %v472_v52  ;;  %v498_v59 = vsel %vm490_vm0, %v472_v52, 0.0  ;;  %v547_v61 = vrot.slane %v533_v21, %v80_v16  ;;  %v561_v63 = vsel %vm490_vm0, %v530_v24, 0.0 }
  0x11   :  { %400 = vmatprep.subr.mxu1 %v151_v48  ;;  %364 = vmatprep.mubr.f32.mxu0 %v106_v50  ;;  %v497_v60 = vadd.f32 %v496_v55, %v495_v54  ;;  %v548_v62 = vcombine.high %v540_v57, %v540_v57  ;;  %v481_v0 = vcombine.high %v479_v53, %v479_v53  ;;  %v563_v3 = vsel %vm490_vm0, %v532_v56, 0.0 }
  0x12   :  { %401 = vmatpush1.xpose.msra.mxu1 %v149_v40  ;;  %434 = vmatprep.mubr.f32.mxu1 %v107_v51  ;;  %v500_v1 = vsel %vm490_vm0, %v480_v58, 0.0  ;;  %v562_v2 = vadd.f32 %v561_v63, %v560_v42  ;;  %v565_v5 = vsel %vm490_vm0, %v540_v57, 0.0  ;;  %v502_v6 = vsel %vm490_vm0, %v479_v53, 0.0 }
  0x13   :  { %365 = vmatmul.mubr.f32.vlgmr.msra.gmra.mxu0 %v98_v41  ;;  %v499_v4 = vadd.f32 %v498_v59, %v497_v60  ;;  %v549_v9 = vcombine.high %v547_v61, %v547_v61  ;;  %v567_v10 = vsel %vm490_vm0, %v548_v62, 0.0  ;;  %v504_v11 = vsel %vm490_vm0, %v481_v0, 0.0 }
  0x14   :  { %v564_v7 = vadd.f32 %v563_v3, %v562_v2  ;;  %v569_v14 = vsel %vm490_vm0, %v547_v61, 0.0  ;;  %v608_v20 = vmov 0.0  }
  0x15   :  { %435 = vmatmul.mubr.f32.vlgmr.msra.gmra.mxu1 %v105_v44  ;;  %v501_v8 = vadd.f32 %v500_v1, %v499_v4  ;;  %v571_v17 = vsel %vm490_vm0, %v549_v9, 0.0  ;;  %65 = vst.msk [vmem:[%s698_s3] sm:$0x3] %vm64_vm1, %v608_v20  ;;  %66 = vst.msk [vmem:[%s700_s4] sm:$0x3] %vm64_vm1, %v608_v20 }
  0x16   :  { %v566_v12 = vadd.f32 %v565_v5, %v564_v7  ;;  %63 = vst.msk [vmem:[%s699_s2] sm:$0x3] %vm62_vm2, %v608_v20 }
  0x17   :  { %v503_v13 = vadd.f32 %v502_v6, %v501_v8 }
  0x18   :  { %v568_v15 = vadd.f32 %v567_v10, %v566_v12 }
  0x19   :  { %v505_v16 = vadd.f32 %v504_v11, %v503_v13 }
  0x1a   :  { %v570_v18 = vadd.f32 %v569_v14, %v568_v15 }
  0x1b   :  { %506 = vadd.xlane.f32.xlu0 %v505_v16 }
  0x1c   :  { %v572_v19 = vadd.f32 %v571_v17, %v570_v18  ;;  %v443_v21 = vld [vmem:[%s698_s3] sm:$0x3] }
  0x1d   :  { %v511_v24 = vld [vmem:[%s700_s4] sm:$0x3] }
  0x1e   :  { %v71_v34 = vld [vmem:[%s699_s2] sm:$0x3] }
  0x1f   :  { %573 = vadd.xlane.f32.xlu0 %v572_v19 }
  0xa4   :  { %v507_v22 = vpop.xlane.xlu0 %506 }
  0xa5   :  { %v508_v23 = vadd.f32 %v507_v22, %v443_v21 }
  0xa7   :  { %510 = vst.msk [vmem:[%s698_s3] sm:$0x3] %vm64_vm1, %v508_v23 }
  0xa8   :  { %v574_v25 = vpop.xlane.xlu0 %573 }
  0xa9   :  { %v575_v26 = vadd.f32 %v574_v25, %v511_v24 }
  0xab   :  { %576 = vst.msk [vmem:[%s700_s4] sm:$0x3] %vm64_vm1, %v575_v26 }
  0xcf   :  { %v226_v27 = vpop.f32.mrf.mxu0 }
  0xd0   :  { %v296_v28 = vpop.f32.mrf.mxu1 }
  0xd1   :  { %v228_v29 = vpop.f32.mrf.mxu0  ;;  %v297_v30 = vadd.f32 %v296_v28, %v226_v27 }
  0xd2   :  { %v298_v31 = vpop.f32.mrf.mxu1 }
  0xd3   :  { %v366_v32 = vpop.f32.mrf.mxu0 }
  0xd4   :  { %v367_v33 = vadd.f32 %v366_v32, %v297_v30 }
  0xd5   :  { %v436_v35 = vpop.f32.mrf.mxu1  ;;  %v368_v36 = vpop.f32.mrf.mxu0 }
  0xd6   :  { %v437_v37 = vadd.f32 %v436_v35, %v367_v33 }
  0xd7   :  { %v438_v38 = vpop.f32.mrf.mxu1 }
  0xd8   :  { %v440_v39 = vadd.f32 %v437_v37, %v71_v34 }
  0xda   :  { %442 = vst.msk [vmem:[%s699_s2] sm:$0x3] %vm62_vm2, %v440_v39 }

</bundles_post_ra>
